<compile_context>
chip_gen: v6e
topology: v6e:2x2x1
jax: 0.10.0
libtpu: 0.0.40
codegen_flags: <defaults>
</compile_context>

<pallas_src>
import math
from functools import partial

import jax
import jax.numpy as jnp
from jax.experimental import pallas as pl
from jax.experimental.pallas import tpu as pltpu


def _round_up(a, m):
    return ((a + m - 1) // m) * m


def mlp_kernel(x_ref, w1_ref, b1_ref, w2_ref, b2_ref, w3_ref, b3_ref, o_ref):
    """One batch tile; `pack` batch chunks are stacked on the sublane axis.

    Shapes (per tile):
      x_ref  : (pack*F, TM)  input, batch on lanes, chunk-major on sublanes
      w1_ref : (H, F)        b1_ref : (H, 1)
      w2_ref : (H, H)        b2_ref : (H, 1)
      w3_ref : (H, 1)        b3_ref : (1, 1)  [SMEM scalar]
      o_ref  : (pack, TM)    lane-dense output, one row per packed chunk
    """
    f = w1_ref.shape[1]
    pack = x_ref.shape[0] // f

    xt = x_ref[...]                      # (pack*F, TM) float32
    w1 = w1_ref[...]                     # (H, F)
    b1 = b1_ref[...]                     # (H, 1)
    w2 = w2_ref[...]                     # (H, H)
    b2 = b2_ref[...]                     # (H, 1)
    w3 = w3_ref[...]                     # (H, 1)
    b3 = b3_ref[0, 0]                    # scalar

    for p in range(pack):                # static unroll over packed batch chunks
        xp = xt[p * f:(p + 1) * f, :]    # (F, TM), static sublane slice

        # ---- Layer 1: K = F is tiny -> VPU broadcast-FMA outer products (no MXU).
        acc = w1[:, 0:1] * xp[0:1, :]    # (H,1) * (1,TM) -> (H,TM)
        for k in range(1, f):            # static unroll, F known at trace time
            acc = acc + w1[:, k:k + 1] * xp[k:k + 1, :]
        h = jnp.maximum(acc + b1, 0.0)   # ReLU; dropout p=0 -> identity

        # ---- Layer 2: MXU matmul, lane-dense result (N = TM).
        h = jnp.dot(w2, h, preferred_element_type=jnp.float32) + b2
        h = jnp.maximum(h, 0.0)

        # ---- Layer 3 (output, no activation): N = 1 -> VPU mul + sublane reduce.
        y = jnp.sum(w3 * h, axis=0, keepdims=True) + b3        # (1, TM)
        o_ref[p:p + 1, :] = y.astype(o_ref.dtype)


@partial(jax.jit, static_argnames=("block_batch",))
def mlp_forward(x, params, block_batch=16384):
    """x: (B, F) float32; params in PyTorch layout [(W [out,in], b [out]), ...]."""
    (w1, b1), (w2, b2), (w3, b3) = params
    B, F = x.shape
    H = w1.shape[0]

    # --- sublane packing: stack `pack` contiguous batch chunks on the sublane
    #     axis so the feature-major x uses all 8 sublanes of each f32 tile.
    pack = max(1, 8 // F)
    bc_min = -(-B // pack)                                  # per-chunk batch (ceil)
    bc_lane = max(128, _round_up(bc_min, 128))              # lane-aligned

    # --- batch tiling: big lane-aligned tiles, balanced across >=2 grid steps
    #     whenever there is enough work (keeps both v7x TensorCores busy).
    tm_cap = max(128, (min(block_batch, bc_lane) // 128) * 128)
    grid_b = pl.cdiv(bc_lane, tm_cap)
    if grid_b == 1 and bc_lane >= 256:
        grid_b = 2
    tm = max(128, _round_up(-(-bc_lane // grid_b), 128))
    grid_b = pl.cdiv(bc_lane, tm)
    Bc = grid_b * tm                                        # padded per-chunk batch
    Bp = pack * Bc                                          # padded total batch

    # --- layout plumbing (fused under jit): pad batch, chunk it, features->sublanes.
    xp = jnp.pad(x.astype(jnp.float32), ((0, Bp - B), (0, 0)))            # (Bp, F)
    xt = xp.reshape(pack, Bc, F).transpose(0, 2, 1).reshape(pack * F, Bc)  # (pack*F, Bc)
    b1c = b1.reshape(H, 1)
    b2c = b2.reshape(H, 1)
    w3c = w3.reshape(1, H).T                                               # (H, 1)
    b3s = b3.reshape(1, 1)

    # --- VMEM budget: pipelined I/O buffers + a few live (H, tm) f32 temporaries.
    est_bytes = (2 * (pack * F * tm * 4)      # x double-buffer
                 + 2 * (pack * tm * 4)        # output double-buffer
                 + 6 * (H * tm * 4))          # in-kernel temporaries (headroom)
    vmem_limit = int(min(max(32 * 1024 * 1024, 1.25 * est_bytes), 100 * 1024 * 1024))

    out = pl.pallas_call(
        mlp_kernel,
        out_shape=jax.ShapeDtypeStruct((pack, Bc), jnp.float32),
        grid=(grid_b,),
        in_specs=[
            pl.BlockSpec((pack * F, tm), lambda i: (0, i)),      # x tile (pipelined)
            pl.BlockSpec((H, F), lambda i: (0, 0)),              # W1 (VMEM-resident)
            pl.BlockSpec((H, 1), lambda i: (0, 0)),              # b1
            pl.BlockSpec((H, H), lambda i: (0, 0)),              # W2
            pl.BlockSpec((H, 1), lambda i: (0, 0)),              # b2
            pl.BlockSpec((H, 1), lambda i: (0, 0)),              # W3 column
            pl.BlockSpec(memory_space=pltpu.MemorySpace.SMEM),   # b3 scalar
        ],
        out_specs=pl.BlockSpec((pack, tm), lambda i: (0, i)),    # lane-dense output
        compiler_params=pltpu.CompilerParams(
            dimension_semantics=("parallel",),                   # v7x megacore
            vmem_limit_bytes=vmem_limit),
    )(xt, w1, b1c, w2, b2c, w3c, b3s)

    # out[p, c] corresponds to batch index p*Bc + c -> row-major flatten restores order.
    return out.reshape(Bp)[:B].reshape(B, 1)


def init_params(key, input_size, hidden_size, n_layers):
    """nn.Linear-style init, PyTorch layout: W [out, in], b [out]."""
    sizes = [input_size] + [hidden_size] * (n_layers - 1) + [1]
    params = []
    for i in range(n_layers):
        fan_in, fan_out = sizes[i], sizes[i + 1]
        key, kw, kb = jax.random.split(key, 3)
        bound = 1.0 / math.sqrt(fan_in)
        w = jax.random.uniform(kw, (fan_out, fan_in), jnp.float32, -bound, bound)
        b = jax.random.uniform(kb, (fan_out,), jnp.float32, -bound, bound)
        params.append((w, b))
    return params


def ref_forward(x, params):
    (w1, b1), (w2, b2), (w3, b3) = params
    h = jnp.maximum(x @ w1.T + b1, 0.0)
    h = jnp.maximum(h @ w2.T + b2, 0.0)
    return h @ w3.T + b3


if __name__ == "__main__":
    # Small shapes consistent with the module: batch=8, input_size=4,
    # hidden_size=32, n_layers=3, activation='ReLU', p=0.0.
    batch, input_size, hidden_size, n_layers = 8, 4, 32, 3

    key = jax.random.PRNGKey(0)
    key, kx = jax.random.split(key)
    x = jax.random.normal(kx, (batch, input_size), jnp.float32)
    params = init_params(key, input_size, hidden_size, n_layers)

    y = jax.block_until_ready(mlp_forward(x, params))
    y_ref = ref_forward(x, params)
    assert y.shape == (batch, 1)
    assert jnp.allclose(y, y_ref, atol=1e-4, rtol=1e-4)

    # Exercise the batch grid + ragged last chunk (2 packed chunks x 2 tiles of 256).
    key, kx2 = jax.random.split(key)
    x2 = jax.random.normal(kx2, (1000, input_size), jnp.float32)
    y2 = jax.block_until_ready(mlp_forward(x2, params, block_batch=256))
    y2_ref = ref_forward(x2, params)
    assert y2.shape == (1000, 1)
    assert jnp.allclose(y2, y2_ref, atol=1e-4, rtol=1e-4)

    # Exercise the default large tile and the >=2-tile (megacore) path.
    key, kx3 = jax.random.split(key)
    x3 = jax.random.normal(kx3, (70000, input_size), jnp.float32)
    y3 = jax.block_until_ready(mlp_forward(x3, params))
    y3_ref = ref_forward(x3, params)
    assert y3.shape == (70000, 1)
    assert jnp.allclose(y3, y3_ref, atol=1e-4, rtol=1e-4)

    print("KERNEL_OK")
</pallas_src>

<mosaic_0001>
module attributes {stable_mosaic.version = 11 : i64} {
  func.func @mlp_kernel(%arg0: i32, %arg1: memref<8x128xf32, #tpu.memory_space<vmem>>, %arg2: memref<32x4xf32, #tpu.memory_space<vmem>>, %arg3: memref<32x1xf32, #tpu.memory_space<vmem>>, %arg4: memref<32x32xf32, #tpu.memory_space<vmem>>, %arg5: memref<32x1xf32, #tpu.memory_space<vmem>>, %arg6: memref<32x1xf32, #tpu.memory_space<vmem>>, %arg7: memref<1x1xf32, #tpu.memory_space<smem>>, %arg8: memref<2x128xf32, #tpu.memory_space<vmem>>) attributes {dimension_semantics = [#tpu.dimension_semantics<parallel>], iteration_bounds = array<i64: 1>, scalar_prefetch = 0 : i64, scratch_operands = 0 : i64, tpu.core_type = #tpu.core_type<tc>, window_params = [{transform_indices = @transform_0, window_bounds = array<i64: 8, 128>}, {pipeline_mode = #tpu.pipeline_mode<synchronous>, transform_indices = @transform_1, window_bounds = array<i64: 32, 4>}, {pipeline_mode = #tpu.pipeline_mode<synchronous>, transform_indices = @transform_2, window_bounds = array<i64: 32, 1>}, {pipeline_mode = #tpu.pipeline_mode<synchronous>, transform_indices = @transform_3, window_bounds = array<i64: 32, 32>}, {pipeline_mode = #tpu.pipeline_mode<synchronous>, transform_indices = @transform_4, window_bounds = array<i64: 32, 1>}, {pipeline_mode = #tpu.pipeline_mode<synchronous>, transform_indices = @transform_5, window_bounds = array<i64: 32, 1>}, {transform_indices = @transform_6, window_bounds = array<i64: 1, 1>}, {transform_indices = @transform_7, window_bounds = array<i64: 2, 128>}]} {
    %c0 = arith.constant 0 : index
    %c0_0 = arith.constant 0 : index
    %0 = vector.load %arg1[%c0, %c0_0] : memref<8x128xf32, #tpu.memory_space<vmem>>, vector<8x128xf32>
    %c0_1 = arith.constant 0 : index
    %c0_2 = arith.constant 0 : index
    %1 = vector.load %arg2[%c0_1, %c0_2] : memref<32x4xf32, #tpu.memory_space<vmem>>, vector<32x4xf32>
    %c0_3 = arith.constant 0 : index
    %c0_4 = arith.constant 0 : index
    %2 = vector.load %arg3[%c0_3, %c0_4] : memref<32x1xf32, #tpu.memory_space<vmem>>, vector<32x1xf32>
    %c0_5 = arith.constant 0 : index
    %c0_6 = arith.constant 0 : index
    %3 = vector.load %arg4[%c0_5, %c0_6] : memref<32x32xf32, #tpu.memory_space<vmem>>, vector<32x32xf32>
    %c0_7 = arith.constant 0 : index
    %c0_8 = arith.constant 0 : index
    %4 = vector.load %arg5[%c0_7, %c0_8] : memref<32x1xf32, #tpu.memory_space<vmem>>, vector<32x1xf32>
    %c0_9 = arith.constant 0 : index
    %c0_10 = arith.constant 0 : index
    %5 = vector.load %arg6[%c0_9, %c0_10] : memref<32x1xf32, #tpu.memory_space<vmem>>, vector<32x1xf32>
    %c0_11 = arith.constant 0 : index
    %c0_12 = arith.constant 0 : index
    %6 = memref.load %arg7[%c0_11, %c0_12] : memref<1x1xf32, #tpu.memory_space<smem>>
    %7 = vector.extract_strided_slice %0 {offsets = [0, 0], sizes = [4, 128], strides = [1, 1]} : vector<8x128xf32> to vector<4x128xf32>
    %8 = vector.extract_strided_slice %1 {offsets = [0, 0], sizes = [32, 1], strides = [1, 1]} : vector<32x4xf32> to vector<32x1xf32>
    %9 = vector.extract_strided_slice %7 {offsets = [0, 0], sizes = [1, 128], strides = [1, 1]} : vector<4x128xf32> to vector<1x128xf32>
    %10 = vector.broadcast %8 : vector<32x1xf32> to vector<32x128xf32>
    %11 = vector.broadcast %9 : vector<1x128xf32> to vector<32x128xf32>
    %12 = arith.mulf %10, %11 : vector<32x128xf32>
    %13 = vector.extract_strided_slice %1 {offsets = [0, 1], sizes = [32, 1], strides = [1, 1]} : vector<32x4xf32> to vector<32x1xf32>
    %14 = vector.extract_strided_slice %7 {offsets = [1, 0], sizes = [1, 128], strides = [1, 1]} : vector<4x128xf32> to vector<1x128xf32>
    %15 = vector.broadcast %13 : vector<32x1xf32> to vector<32x128xf32>
    %16 = vector.broadcast %14 : vector<1x128xf32> to vector<32x128xf32>
    %17 = arith.mulf %15, %16 : vector<32x128xf32>
    %18 = arith.addf %12, %17 : vector<32x128xf32>
    %19 = vector.extract_strided_slice %1 {offsets = [0, 2], sizes = [32, 1], strides = [1, 1]} : vector<32x4xf32> to vector<32x1xf32>
    %20 = vector.extract_strided_slice %7 {offsets = [2, 0], sizes = [1, 128], strides = [1, 1]} : vector<4x128xf32> to vector<1x128xf32>
    %21 = vector.broadcast %19 : vector<32x1xf32> to vector<32x128xf32>
    %22 = vector.broadcast %20 : vector<1x128xf32> to vector<32x128xf32>
    %23 = arith.mulf %21, %22 : vector<32x128xf32>
    %24 = arith.addf %18, %23 : vector<32x128xf32>
    %25 = vector.extract_strided_slice %1 {offsets = [0, 3], sizes = [32, 1], strides = [1, 1]} : vector<32x4xf32> to vector<32x1xf32>
    %26 = vector.extract_strided_slice %7 {offsets = [3, 0], sizes = [1, 128], strides = [1, 1]} : vector<4x128xf32> to vector<1x128xf32>
    %27 = vector.broadcast %25 : vector<32x1xf32> to vector<32x128xf32>
    %28 = vector.broadcast %26 : vector<1x128xf32> to vector<32x128xf32>
    %29 = arith.mulf %27, %28 : vector<32x128xf32>
    %30 = arith.addf %24, %29 : vector<32x128xf32>
    %31 = vector.broadcast %2 : vector<32x1xf32> to vector<32x128xf32>
    %32 = arith.addf %30, %31 : vector<32x128xf32>
    %cst = arith.constant 0.000000e+00 : f32
    %33 = vector.broadcast %cst : f32 to vector<32x128xf32>
    %34 = arith.maximumf %32, %33 : vector<32x128xf32>
    %cst_13 = arith.constant dense<0.000000e+00> : vector<32x128xf32>
    %35 = tpu.matmul %3, %34, %cst_13 {dimension_numbers = #tpu.dot_dimension_numbers<[1], [0], [0], [1], [0, 0, 1, 1], [], []>} : vector<32x32xf32>, vector<32x128xf32>, vector<32x128xf32> -> vector<32x128xf32>
    %36 = vector.broadcast %4 : vector<32x1xf32> to vector<32x128xf32>
    %37 = arith.addf %35, %36 : vector<32x128xf32>
    %cst_14 = arith.constant 0.000000e+00 : f32
    %38 = vector.broadcast %cst_14 : f32 to vector<32x128xf32>
    %39 = arith.maximumf %37, %38 : vector<32x128xf32>
    %40 = vector.broadcast %5 : vector<32x1xf32> to vector<32x128xf32>
    %41 = arith.mulf %40, %39 : vector<32x128xf32>
    %cst_15 = arith.constant dense<0.000000e+00> : vector<128xf32>
    %42 = vector.multi_reduction <add>, %41, %cst_15 [0] : vector<32x128xf32> to vector<128xf32>
    %43 = vector.shape_cast %42 : vector<128xf32> to vector<1x128xf32>
    %44 = vector.broadcast %6 : f32 to vector<1x128xf32>
    %45 = arith.addf %43, %44 : vector<1x128xf32>
    %c0_16 = arith.constant 0 : index
    %c0_17 = arith.constant 0 : index
    %46 = vector.load %arg8[%c0_16, %c0_17] : memref<2x128xf32, #tpu.memory_space<vmem>>, vector<1x128xf32>
    tpu.vector_store %arg8[%c0_16, %c0_17], %45 {strides = array<i32>} : memref<2x128xf32, #tpu.memory_space<vmem>>, vector<1x128xf32>,
    %47 = vector.extract_strided_slice %0 {offsets = [4, 0], sizes = [4, 128], strides = [1, 1]} : vector<8x128xf32> to vector<4x128xf32>
    %48 = vector.extract_strided_slice %1 {offsets = [0, 0], sizes = [32, 1], strides = [1, 1]} : vector<32x4xf32> to vector<32x1xf32>
    %49 = vector.extract_strided_slice %47 {offsets = [0, 0], sizes = [1, 128], strides = [1, 1]} : vector<4x128xf32> to vector<1x128xf32>
    %50 = vector.broadcast %48 : vector<32x1xf32> to vector<32x128xf32>
    %51 = vector.broadcast %49 : vector<1x128xf32> to vector<32x128xf32>
    %52 = arith.mulf %50, %51 : vector<32x128xf32>
    %53 = vector.extract_strided_slice %1 {offsets = [0, 1], sizes = [32, 1], strides = [1, 1]} : vector<32x4xf32> to vector<32x1xf32>
    %54 = vector.extract_strided_slice %47 {offsets = [1, 0], sizes = [1, 128], strides = [1, 1]} : vector<4x128xf32> to vector<1x128xf32>
    %55 = vector.broadcast %53 : vector<32x1xf32> to vector<32x128xf32>
    %56 = vector.broadcast %54 : vector<1x128xf32> to vector<32x128xf32>
    %57 = arith.mulf %55, %56 : vector<32x128xf32>
    %58 = arith.addf %52, %57 : vector<32x128xf32>
    %59 = vector.extract_strided_slice %1 {offsets = [0, 2], sizes = [32, 1], strides = [1, 1]} : vector<32x4xf32> to vector<32x1xf32>
    %60 = vector.extract_strided_slice %47 {offsets = [2, 0], sizes = [1, 128], strides = [1, 1]} : vector<4x128xf32> to vector<1x128xf32>
    %61 = vector.broadcast %59 : vector<32x1xf32> to vector<32x128xf32>
    %62 = vector.broadcast %60 : vector<1x128xf32> to vector<32x128xf32>
    %63 = arith.mulf %61, %62 : vector<32x128xf32>
    %64 = arith.addf %58, %63 : vector<32x128xf32>
    %65 = vector.extract_strided_slice %1 {offsets = [0, 3], sizes = [32, 1], strides = [1, 1]} : vector<32x4xf32> to vector<32x1xf32>
    %66 = vector.extract_strided_slice %47 {offsets = [3, 0], sizes = [1, 128], strides = [1, 1]} : vector<4x128xf32> to vector<1x128xf32>
    %67 = vector.broadcast %65 : vector<32x1xf32> to vector<32x128xf32>
    %68 = vector.broadcast %66 : vector<1x128xf32> to vector<32x128xf32>
    %69 = arith.mulf %67, %68 : vector<32x128xf32>
    %70 = arith.addf %64, %69 : vector<32x128xf32>
    %71 = vector.broadcast %2 : vector<32x1xf32> to vector<32x128xf32>
    %72 = arith.addf %70, %71 : vector<32x128xf32>
    %cst_18 = arith.constant 0.000000e+00 : f32
    %73 = vector.broadcast %cst_18 : f32 to vector<32x128xf32>
    %74 = arith.maximumf %72, %73 : vector<32x128xf32>
    %cst_19 = arith.constant dense<0.000000e+00> : vector<32x128xf32>
    %75 = tpu.matmul %3, %74, %cst_19 {dimension_numbers = #tpu.dot_dimension_numbers<[1], [0], [0], [1], [0, 0, 1, 1], [], []>} : vector<32x32xf32>, vector<32x128xf32>, vector<32x128xf32> -> vector<32x128xf32>
    %76 = vector.broadcast %4 : vector<32x1xf32> to vector<32x128xf32>
    %77 = arith.addf %75, %76 : vector<32x128xf32>
    %cst_20 = arith.constant 0.000000e+00 : f32
    %78 = vector.broadcast %cst_20 : f32 to vector<32x128xf32>
    %79 = arith.maximumf %77, %78 : vector<32x128xf32>
    %80 = vector.broadcast %5 : vector<32x1xf32> to vector<32x128xf32>
    %81 = arith.mulf %80, %79 : vector<32x128xf32>
    %cst_21 = arith.constant dense<0.000000e+00> : vector<128xf32>
    %82 = vector.multi_reduction <add>, %81, %cst_21 [0] : vector<32x128xf32> to vector<128xf32>
    %83 = vector.shape_cast %82 : vector<128xf32> to vector<1x128xf32>
    %84 = vector.broadcast %6 : f32 to vector<1x128xf32>
    %85 = arith.addf %83, %84 : vector<1x128xf32>
    %c1 = arith.constant 1 : index
    %c0_22 = arith.constant 0 : index
    %86 = vector.load %arg8[%c1, %c0_22] : memref<2x128xf32, #tpu.memory_space<vmem>>, vector<1x128xf32>
    tpu.vector_store %arg8[%c1, %c0_22], %85 {strides = array<i32>} : memref<2x128xf32, #tpu.memory_space<vmem>>, vector<1x128xf32>,
    return
  }
  func.func @transform_0(%arg0: i32) -> (i32, i32) {
    %c0_i32 = arith.constant 0 : i32
    %c0_i32_0 = arith.constant 0 : i32
    return %c0_i32, %arg0 : i32, i32
  }
  func.func @transform_1(%arg0: i32) -> (i32, i32) {
    %c0_i32 = arith.constant 0 : i32
    %c0_i32_0 = arith.constant 0 : i32
    %c0_i32_1 = arith.constant 0 : i32
    return %c0_i32, %c0_i32_0 : i32, i32
  }
  func.func @transform_2(%arg0: i32) -> (i32, i32) {
    %c0_i32 = arith.constant 0 : i32
    %c0_i32_0 = arith.constant 0 : i32
    %c0_i32_1 = arith.constant 0 : i32
    return %c0_i32, %c0_i32_0 : i32, i32
  }
  func.func @transform_3(%arg0: i32) -> (i32, i32) {
    %c0_i32 = arith.constant 0 : i32
    %c0_i32_0 = arith.constant 0 : i32
    %c0_i32_1 = arith.constant 0 : i32
    return %c0_i32, %c0_i32_0 : i32, i32
  }
  func.func @transform_4(%arg0: i32) -> (i32, i32) {
    %c0_i32 = arith.constant 0 : i32
    %c0_i32_0 = arith.constant 0 : i32
    %c0_i32_1 = arith.constant 0 : i32
    return %c0_i32, %c0_i32_0 : i32, i32
  }
  func.func @transform_5(%arg0: i32) -> (i32, i32) {
    %c0_i32 = arith.constant 0 : i32
    %c0_i32_0 = arith.constant 0 : i32
    %c0_i32_1 = arith.constant 0 : i32
    return %c0_i32, %c0_i32_0 : i32, i32
  }
  func.func @transform_6(%arg0: i32) -> (i32, i32) {
    %c0_i32 = arith.constant 0 : i32
    %c0_i32_0 = arith.constant 0 : i32
    %c0_i32_1 = arith.constant 0 : i32
    return %c0_i32, %c0_i32_0 : i32, i32
  }
  func.func @transform_7(%arg0: i32) -> (i32, i32) {
    %c0_i32 = arith.constant 0 : i32
    %c0_i32_0 = arith.constant 0 : i32
    return %c0_i32, %arg0 : i32, i32
  }
}

</mosaic_0001>

<bundles_post_ra>
// kernel: mlp_forward.1
= control target key start
LH: loop header
LB: loop body
LE: loop exit
PB: predicated region body
PF: predicated region fallthrough
CT: control target
= control target key end

     0   :  { %v580_v0 = vmov 1   ;;  %v581_v1 = vmov 0   ;;  %v582_v5 = vmov 2   ;;  %v583_v6 = vmov 3   ;;  %s744_s1 = inlined_call_operand.vmem [shape: f32[32,4], index: 1, kind: input, shape index: {}]   ;;  %s745_s2 = inlined_call_operand.vmem [shape: f32[32,1], index: 2, kind: input, shape index: {}]   ;;  %s746_s4 = inlined_call_operand.vmem [shape: f32[32,1], index: 4, kind: input, shape index: {}]   ;;  %s747_s5 = inlined_call_operand.vmem [shape: f32[32,1], index: 5, kind: input, shape index: {}]   ;;  %s748_s3 = inlined_call_operand.vmem [shape: f32[32,32], index: 3, kind: input, shape index: {}]   ;;  %s749_s0 = inlined_call_operand.vmem [shape: f32[8,128], index: 0, kind: input, shape index: {}]   ;;  %s750_s6 = inlined_call_operand.<no memory space> [shape: f32[1,1], index: 6, kind: input, shape index: {}]   ;;  %s751_s7 = inlined_call_operand.vmem [shape: f32[2,128], index: 7, kind: output, shape index: {}]  }
   0x1   :  { %563 = vset.pattern.permute.xlu0 %v580_v0  ;;  %565 = vset.pattern.permute.xlu1 %v581_v1  ;;  %v31_v2 = vld [vmem:[%s744_s1 + $0x18] sm:$0xff]  ;;  %v30_v3 = vld [vmem:[%s744_s1 + $0x10] sm:$0xff]  ;;  %v29_v4 = vld [vmem:[%s744_s1 + $0x8] sm:$0xff]  ;;  %vm209_vm0 = vcmask 261120   ;;  %v69_v27 = vlaneseq }
   0x2   :  { %90 = vperm.xlu0 %563, %v31_v2   ;;  %61 = vperm.xlu1 %565, %v30_v3   ;;  %v28_v7 = vld [vmem:[%s744_s1] sm:$0xff]  ;;  %v34_v8 = vld [vmem:[%s745_s2 + $0x10] sm:$0xff]  ;;  %v35_v13 = vld [vmem:[%s745_s2 + $0x18] sm:$0xff] }
   0x3   :  { %v40_v9 = vld [vmem:[%s746_s4] sm:$0xff]  ;;  %v42_v10 = vld [vmem:[%s746_s4 + $0x10] sm:$0xff]  ;;  %v33_v14 = vld [vmem:[%s745_s2 + $0x8] sm:$0xff]  ;;  %v70_v30 = vshrl.u32 %v69_v27, 7 }
   0x4   :  { %v44_v11 = vld [vmem:[%s747_s5] sm:$0xff]  ;;  %v46_v12 = vld [vmem:[%s747_s5 + $0x10] sm:$0xff]  ;;  %v41_v17 = vld [vmem:[%s746_s4 + $0x8] sm:$0xff] }
   0x5   :  { %v32_v15 = vld [vmem:[%s745_s2] sm:$0xff]  ;;  %v43_v18 = vld [vmem:[%s746_s4 + $0x18] sm:$0xff]  ;;  %v45_v19 = vld [vmem:[%s747_s5 + $0x8] sm:$0xff]  ;;  %v95_v31 = vsub.s32 1, %v70_v30  ;;  %v357_v32 = vsub.s32 5, %v70_v30  ;;  %v71_v34 = vsub.s32 0, %v70_v30 }
   0x6   :  { %564 = vset.pattern.permute.xlu0 %v581_v1  ;;  %566 = vset.pattern.permute.xlu1 %v580_v0  ;;  %v36_v16 = vld [vmem:[%s748_s3] sm:$0xff]  ;;  %v47_v20 = vld [vmem:[%s747_s5 + $0x18] sm:$0xff]  ;;  %v349_v35 = vsub.s32 4, %v70_v30  ;;  %v123_v40 = vsub.s32 2, %v70_v30  ;;  %v369_v41 = vsub.s32 6, %v70_v30  ;;  %v151_v47 = vsub.s32 3, %v70_v30 }
   0x7   :  { %66 = vperm.xlu0 %564, %v31_v2   ;;  %86 = vperm.xlu1 %566, %v30_v3   ;;  %v27_v37 = vld [vmem:[%s749_s0] sm:$0xff]  ;;  %v381_v48 = vsub.s32 7, %v70_v30 }
   0x8   :  { %539 = vmatprep.mubr.msk.f32.mxu0 %vm209_vm0, %v36_v16  ;;  %553 = vmatprep.mubr.msk.f32.mxu1 %vm209_vm0, %v36_v16  ;;  %v682_v38 = vrot.slane %v27_v37, %v95_v31  ;;  %v684_v39 = vrot.slane %v27_v37, %v357_v32  ;;  %v686_v43 = vrot.slane %v27_v37, %v71_v34 }
   0x9   :  { %v688_v44 = vrot.slane %v27_v37, %v349_v35  ;;  %v124_v54 = vrot.slane %v27_v37, %v123_v40  ;;  %v370_v55 = vrot.slane %v27_v37, %v369_v41  ;;  %v698_v59 = vrot.slane %v27_v37, %v151_v47 }
   0xa   :  { %v700_v60 = vrot.slane %v27_v37, %v381_v48 }
   0xb   :  { %567 = vset.pattern.permute.xlu1 %v582_v5  ;;  %56 = vperm.xlu0 %564, %v29_v4  }
   0xc   :  { %118 = vperm.xlu1 %567, %v31_v2  }
   0xf   :  { %572 = vset.pattern.permute.xlu0 %v582_v5 }
  0x10   :  { %568 = vset.pattern.permute.xlu1 %v580_v0  ;;  %110 = vperm.xlu0 %572, %v29_v4  }
  0x11   :  { %82 = vperm.xlu1 %568, %v29_v4  }
  0x14   :  { %573 = vset.pattern.permute.xlu0 %v583_v6 }
  0x15   :  { %569 = vset.pattern.permute.xlu1 %v582_v5  ;;  %146 = vperm.xlu0 %573, %v31_v2  }
  0x16   :  { %114 = vperm.xlu1 %569, %v30_v3  }
  0x19   :  { %138 = vperm.xlu0 %573, %v29_v4  }
  0x1a   :  { %570 = vset.pattern.permute.xlu1 %v581_v1 }
  0x1b   :  { %51 = vperm.xlu1 %570, %v28_v7  }
  0x1d   :  { %578 = vset.pattern.permute.xlu0 %v581_v1 }
  0x1e   :  { %173 = vperm.xlu0 %578, %v34_v8  }
  0x1f   :  { %571 = vset.pattern.permute.xlu1 %v580_v0 }
  0x20   :  { %78 = vperm.xlu1 %571, %v28_v7  }
  0x22   :  { %191 = vperm.xlu0 %578, %v40_v9  }
  0x24   :  { %574 = vset.pattern.permute.xlu1 %v583_v6 }
  0x25   :  { %142 = vperm.xlu1 %574, %v30_v3  }
  0x26   :  { %201 = vperm.xlu0 %578, %v42_v10  }
  0x29   :  { %575 = vset.pattern.permute.xlu1 %v582_v5 }
  0x2a   :  { %106 = vperm.xlu1 %575, %v28_v7   ;;  %313 = vperm.xlu0 %578, %v44_v11  }
  0x2e   :  { %576 = vset.pattern.permute.xlu1 %v581_v1  ;;  %323 = vperm.xlu0 %578, %v46_v12  }
  0x2f   :  { %178 = vperm.xlu1 %576, %v35_v13  }
  0x33   :  { %577 = vset.pattern.permute.xlu1 %v583_v6 }
  0x34   :  { %134 = vperm.xlu1 %577, %v28_v7  }
  0x38   :  { %579 = vset.pattern.permute.xlu1 %v581_v1 }
  0x39   :  { %168 = vperm.xlu1 %579, %v33_v14  }
  0x3d   :  { %163 = vperm.xlu1 %579, %v32_v15  }
  0x41   :  { %196 = vperm.xlu1 %579, %v41_v17  }
  0x45   :  { %206 = vperm.xlu1 %579, %v43_v18  }
  0x49   :  { %318 = vperm.xlu1 %579, %v45_v19  }
  0x4d   :  { %328 = vperm.xlu1 %579, %v47_v20  }
  0x7d   :  { %v62_v21 = vpop.permute.xlu1 %61  ;;  %v91_v23 = vpop.permute.xlu0 %90 }
  0x7e   :  { %v100_v45 = vmul.f32 %v682_v38, %v91_v23  ;;  %v362_v46 = vmul.f32 %v684_v39, %v91_v23  ;;  %v75_v56 = vmul.f32 %v686_v43, %v62_v21  ;;  %v353_v57 = vmul.f32 %v688_v44, %v62_v21 }
  0x82   :  { %v87_v22 = vpop.permute.xlu1 %86  ;;  %v67_v25 = vpop.permute.xlu0 %66 }
  0x83   :  { %v99_v49 = vmul.f32 %v682_v38, %v87_v22  ;;  %v361_v50 = vmul.f32 %v684_v39, %v87_v22  ;;  %v76_v51 = vmul.f32 %v686_v43, %v67_v25  ;;  %v354_v52 = vmul.f32 %v688_v44, %v67_v25 }
  0x85   :  { %v103_v63 = vadd.f32 %v99_v49, %v75_v56  ;;  %v365_v0 = vadd.f32 %v361_v50, %v353_v57  ;;  %v104_v1 = vadd.f32 %v100_v45, %v76_v51  ;;  %v366_v2 = vadd.f32 %v362_v46, %v354_v52 }
  0x86   :  { %v57_v29 = vpop.permute.xlu0 %56 }
  0x87   :  { %v119_v24 = vpop.permute.xlu1 %118  ;;  %v74_v17 = vmul.f32 %v686_v43, %v57_v29  ;;  %v352_v18 = vmul.f32 %v688_v44, %v57_v29 }
  0x88   :  { %v128_v3 = vmul.f32 %v124_v54, %v119_v24  ;;  %v374_v4 = vmul.f32 %v370_v55, %v119_v24 }
  0x8a   :  { %v132_v13 = vadd.f32 %v128_v3, %v104_v1  ;;  %v378_v14 = vadd.f32 %v374_v4, %v366_v2 }
  0x8b   :  { %v111_v36 = vpop.permute.xlu0 %110 }
  0x8c   :  { %v83_v26 = vpop.permute.xlu1 %82  ;;  %v126_v34 = vmul.f32 %v124_v54, %v111_v36  ;;  %v372_v35 = vmul.f32 %v370_v55, %v111_v36 }
  0x8d   :  { %v98_v19 = vmul.f32 %v682_v38, %v83_v26  ;;  %v360_v20 = vmul.f32 %v684_v39, %v83_v26 }
  0x8f   :  { %v102_v31 = vadd.f32 %v98_v19, %v74_v17  ;;  %v364_v32 = vadd.f32 %v360_v20, %v352_v18 }
  0x90   :  { %v147_v53 = vpop.permute.xlu0 %146 }
  0x91   :  { %v115_v28 = vpop.permute.xlu1 %114  ;;  %v156_v8 = vmul.f32 %v698_v59, %v147_v53  ;;  %v386_v9 = vmul.f32 %v700_v60, %v147_v53  ;;  %v130_v49 = vadd.f32 %v126_v34, %v102_v31  ;;  %v376_v50 = vadd.f32 %v372_v35, %v364_v32 }
  0x92   :  { %v127_v61 = vmul.f32 %v124_v54, %v115_v28  ;;  %v373_v62 = vmul.f32 %v370_v55, %v115_v28 }
  0x93   :  { %v160_v22 = vadd.f32 %v156_v8, %v132_v13  ;;  %v390_v23 = vadd.f32 %v386_v9, %v378_v14 }
  0x94   :  { %v139_v7 = vpop.permute.xlu0 %138  ;;  %v131_v10 = vadd.f32 %v127_v61, %v103_v63  ;;  %v377_v11 = vadd.f32 %v373_v62, %v365_v0 }
  0x95   :  { %v154_v29 = vmul.f32 %v698_v59, %v139_v7  ;;  %v384_v41 = vmul.f32 %v700_v60, %v139_v7 }
  0x96   :  { %v677_v33 = vpop.permute.xlu1 %51 }
  0x97   :  { %v73_v36 = vmul.f32 %v686_v43, %v677_v33  ;;  %v351_v51 = vmul.f32 %v688_v44, %v677_v33 }
  0x99   :  { %v174_v21 = vpop.permute.xlu0 %173 }
  0x9b   :  { %v79_v42 = vpop.permute.xlu1 %78 }
  0x9c   :  { %v97_v26 = vmul.f32 %v682_v38, %v79_v42  ;;  %v359_v45 = vmul.f32 %v684_v39, %v79_v42  ;;  %v158_v38 = vadd.f32 %v154_v29, %v130_v49  ;;  %v388_v39 = vadd.f32 %v384_v41, %v376_v50 }
  0x9d   :  { %v192_v7 = vpop.permute.xlu0 %191 }
  0x9e   :  { %v101_v42 = vadd.f32 %v97_v26, %v73_v36  ;;  %v363_v56 = vadd.f32 %v359_v45, %v351_v51 }
  0xa0   :  { %v143_v58 = vpop.permute.xlu1 %142 }
  0xa1   :  { %v155_v5 = vmul.f32 %v698_v59, %v143_v58  ;;  %v385_v6 = vmul.f32 %v700_v60, %v143_v58  ;;  %v202_v9 = vpop.permute.xlu0 %201 }
  0xa3   :  { %v159_v15 = vadd.f32 %v155_v5, %v131_v10  ;;  %v389_v16 = vadd.f32 %v385_v6, %v377_v11  ;;  %v38_v5 = vld [vmem:[%s748_s3 + $0x10] sm:$0xff]  ;;  %v39_v6 = vld [vmem:[%s748_s3 + $0x18] sm:$0xff] }
  0xa5   :  { %v107_v12 = vpop.permute.xlu1 %106  ;;  %v183_v25 = vadd.f32 %v174_v21, %v159_v15  ;;  %v393_v27 = vadd.f32 %v389_v16, %v174_v21  ;;  %v314_v17 = vpop.permute.xlu0 %313 }
  0xa6   :  { %v125_v52 = vmul.f32 %v124_v54, %v107_v12  ;;  %v371_v53 = vmul.f32 %v370_v55, %v107_v12 }
  0xa7   :  { %v187_v46 = vmax.f32 %v183_v25, 0.0  ;;  %v397_v47 = vmax.f32 %v393_v27, 0.0 }
  0xa8   :  { %v129_v61 = vadd.f32 %v125_v52, %v101_v42  ;;  %v375_v62 = vadd.f32 %v371_v53, %v363_v56 }
  0xaa   :  { %v179_v24 = vpop.permute.xlu1 %178 }
  0xab   :  { %v184_v28 = vadd.f32 %v179_v24, %v160_v22  ;;  %v394_v30 = vadd.f32 %v390_v23, %v179_v24 }
  0xad   :  { %v188_v37 = vmax.f32 %v184_v28, 0.0  ;;  %v398_v40 = vmax.f32 %v394_v30, 0.0 }
  0xaf   :  { %v135_v48 = vpop.permute.xlu1 %134  ;;  %531 = vmatprep.subr.mxu0 %v188_v37  ;;  %545 = vmatprep.subr.mxu1 %v398_v40 }
  0xb0   :  { %532 = vmatpush3.msra.mxu0 %v188_v37  ;;  %546 = vmatpush3.msra.mxu1 %v398_v40  ;;  %v153_v57 = vmul.f32 %v698_v59, %v135_v48  ;;  %v383_v58 = vmul.f32 %v700_v60, %v135_v48  ;;  %v37_v60 = vld [vmem:[%s748_s3 + $0x8] sm:$0xff]  ;;  %v324_v48 = vpop.permute.xlu0 %323 }
  0xb1   :  { %533 = vmatprep.subr.mxu0 %v187_v46  ;;  %547 = vmatprep.subr.mxu1 %v397_v47 }
  0xb2   :  { %534 = vmatpush3.msra.mxu0 %v187_v46  ;;  %548 = vmatpush3.msra.mxu1 %v397_v47  ;;  %v157_v54 = vadd.f32 %v153_v57, %v129_v61  ;;  %v387_v55 = vadd.f32 %v383_v58, %v375_v62 }
  0xb4   :  { %v169_v43 = vpop.permute.xlu1 %168 }
  0xb5   :  { %v182_v63 = vadd.f32 %v169_v43, %v158_v38  ;;  %v392_v0 = vadd.f32 %v388_v39, %v169_v43 }
  0xb7   :  { %v186_v33 = vmax.f32 %v182_v63, 0.0  ;;  %v396_v44 = vmax.f32 %v392_v0, 0.0 }
  0xb8   :  { %v164_v1 = vpop.permute.xlu1 %163 }
  0xb9   :  { %v181_v2 = vadd.f32 %v164_v1, %v157_v54  ;;  %v391_v3 = vadd.f32 %v387_v55, %v164_v1  ;;  %535 = vmatprep.subr.mxu0 %v186_v33  ;;  %549 = vmatprep.subr.mxu1 %v396_v44  ;;  %v344_v1 = vstv %s750_s6 }
  0xba   :  { %536 = vmatpush3.msra.mxu0 %v186_v33  ;;  %550 = vmatpush3.msra.mxu1 %v396_v44 }
  0xbb   :  { %v185_v4 = vmax.f32 %v181_v2, 0.0  ;;  %v395_v59 = vmax.f32 %v391_v3, 0.0 }
  0xbc   :  { %v197_v8 = vpop.permute.xlu1 %196 }
  0xbd   :  { %537 = vmatprep.subr.mxu0 %v185_v4  ;;  %551 = vmatprep.subr.mxu1 %v395_v59 }
  0xbe   :  { %538 = vmatpush3.msra.mxu0 %v185_v4  ;;  %552 = vmatpush3.msra.mxu1 %v395_v59 }
  0xbf   :  { %540 = vmatmul.mubr.msk.f32.vlgmr.msra.gmra.mxu0 %vm209_vm0, %v37_v60  ;;  %554 = vmatmul.mubr.msk.f32.vlgmr.msra.gmra.mxu1 %vm209_vm0, %v37_v60 }
  0xc0   :  { %542 = vmatprep.mubr.msk.f32.mxu0 %vm209_vm0, %v38_v5  ;;  %556 = vmatprep.mubr.msk.f32.mxu1 %vm209_vm0, %v38_v5  ;;  %v207_v10 = vpop.permute.xlu1 %206 }
  0xc3   :  { %543 = vmatmul.mubr.msk.f32.gmra.mxu0 %vm209_vm0, %v39_v6  ;;  %557 = vmatmul.mubr.msk.f32.gmra.mxu1 %vm209_vm0, %v39_v6 }
  0xc4   :  { %v319_v24 = vpop.permute.xlu1 %318 }
  0xc8   :  { %v329_v52 = vpop.permute.xlu1 %328 }
 0x17f   :  { %v541_v11 = vpop.f32.mrf.mxu0  ;;  %v555_v12 = vpop.f32.mrf.mxu1 }
 0x180   :  { %v294_v13 = vadd.f32 %v541_v11, %v197_v8  ;;  %v471_v14 = vadd.f32 %v555_v12, %v197_v8 }
 0x181   :  { %v288_v15 = vpop.f32.mrf.mxu0  ;;  %v465_v16 = vpop.f32.mrf.mxu1 }
 0x182   :  { %v289_v18 = vadd.f32 %v288_v15, %v192_v7  ;;  %v466_v19 = vadd.f32 %v465_v16, %v192_v7  ;;  %v308_v20 = vmax.f32 %v294_v13, 0.0  ;;  %v485_v21 = vmax.f32 %v471_v14, 0.0 }
 0x183   :  { %v544_v22 = vpop.f32.mrf.mxu0  ;;  %v558_v23 = vpop.f32.mrf.mxu1 }
 0x184   :  { %v307_v25 = vmax.f32 %v289_v18, 0.0  ;;  %v484_v27 = vmax.f32 %v466_v19, 0.0  ;;  %v304_v28 = vadd.f32 %v544_v22, %v207_v10  ;;  %v481_v30 = vadd.f32 %v558_v23, %v207_v10 }
 0x185   :  { %v298_v31 = vpop.f32.mrf.mxu0  ;;  %v475_v32 = vpop.f32.mrf.mxu1  ;;  %v332_v29 = vmul.f32 %v319_v24, %v308_v20  ;;  %v489_v41 = vmul.f32 %v485_v21, %v319_v24 }
 0x186   :  { %v331_v34 = vmul.f32 %v314_v17, %v307_v25  ;;  %v488_v35 = vmul.f32 %v484_v27, %v314_v17  ;;  %v299_v37 = vadd.f32 %v298_v31, %v202_v9  ;;  %v476_v40 = vadd.f32 %v475_v32, %v202_v9 }
 0x187   :  { %v310_v26 = vmax.f32 %v304_v28, 0.0  ;;  %v487_v45 = vmax.f32 %v481_v30, 0.0 }
 0x188   :  { %v309_v46 = vmax.f32 %v299_v37, 0.0  ;;  %v486_v47 = vmax.f32 %v476_v40, 0.0  ;;  %v335_v49 = vadd.f32 %v332_v29, %v331_v34  ;;  %v492_v50 = vadd.f32 %v489_v41, %v488_v35 }
 0x189   :  { %v334_v53 = vmul.f32 %v329_v52, %v310_v26  ;;  %v491_v38 = vmul.f32 %v487_v45, %v329_v52 }
 0x18a   :  { %v333_v36 = vmul.f32 %v324_v48, %v309_v46  ;;  %v490_v51 = vmul.f32 %v486_v47, %v324_v48 }
 0x18c   :  { %v336_v39 = vadd.f32 %v335_v49, %v333_v36  ;;  %v493_v42 = vadd.f32 %v492_v50, %v490_v51 }
 0x18e   :  { %v337_v56 = vadd.f32 %v336_v39, %v334_v53  ;;  %v494_v57 = vadd.f32 %v493_v42, %v491_v38 }
 0x190   :  { %v338_v58 = vrot.slane %v337_v56, 4  ;;  %v495_v43 = vrot.slane %v494_v57, 4 }
 0x192   :  { %v339_v61 = vadd.f32 %v338_v58, %v337_v56  ;;  %v496_v62 = vadd.f32 %v495_v43, %v494_v57 }
 0x194   :  { %v340_v63 = vrot.slane %v339_v61, 2  ;;  %v497_v0 = vrot.slane %v496_v62, 2 }
 0x196   :  { %v341_v33 = vadd.f32 %v340_v63, %v339_v61  ;;  %v498_v44 = vadd.f32 %v497_v0, %v496_v62 }
 0x198   :  { %v342_v54 = vrot.slane %v341_v33, 1  ;;  %v499_v55 = vrot.slane %v498_v44, 1 }
 0x19a   :  { %v343_v2 = vadd.f32 %v342_v54, %v341_v33  ;;  %v500_v3 = vadd.f32 %v499_v55, %v498_v44 }
 0x19c   :  { %v345_v4 = vadd.f32 %v344_v1, %v343_v2  ;;  %v501_v59 = vadd.f32 %v500_v3, %v344_v1 }
 0x19e   :  { %346 = vst [vmem:[%s751_s7] sm:$0x1] %v345_v4  ;;  %502 = vst [vmem:[%s751_s7 + $0x1] sm:$0x1] %v501_v59 }

</bundles_post_ra>
